<compile_context>
chip_gen: v7x
topology: tpu7x:2x2x1
jax: 0.10.0
libtpu: 0.0.40
codegen_flags: <defaults>
</compile_context>

<pallas_src>
import functools

import jax
import jax.numpy as jnp
from jax.experimental import pallas as pl
from jax.experimental.pallas import tpu as pltpu

LANE = 128  # lane width / MXU edge


def _round_up(x: int, m: int) -> int:
    return ((x + m - 1) // m) * m


def f2_kernel(x_ref, w0_ref, b0_ref, w1_ref, b1_ref, w2_ref, b2_ref, o_ref):
    # Layer 0: VPU cast of the f32 x tile to the weight compute dtype, MXU
    # matmul with f32 accumulation, f32 bias + ReLU on the VPU.
    x = x_ref[...].astype(w0_ref.dtype)
    h = jnp.dot(x, w0_ref[...], preferred_element_type=jnp.float32)
    h = jnp.maximum(h + b0_ref[...], 0.0)
    # Layer 1.
    h = jnp.dot(h.astype(w1_ref.dtype), w1_ref[...],
                preferred_element_type=jnp.float32)
    h = jnp.maximum(h + b1_ref[...], 0.0)
    # Layer 2 (no activation).
    out = jnp.dot(h.astype(w2_ref.dtype), w2_ref[...],
                  preferred_element_type=jnp.float32)
    o_ref[...] = (out + b2_ref[...]).astype(o_ref.dtype)


def _vmem_budget_bytes() -> int:
    """Per-generation VMEM ceiling with ~20% headroom for Mosaic scratch."""
    try:
        cap = int(pltpu.get_tpu_info().vmem_capacity_bytes)
    except Exception:
        cap = 64 << 20  # conservative fallback (v7x per-TensorCore VMEM)
    return max(16 << 20, int(cap * 0.8))


def _vmem_estimate(bn, d, h0, h1, k, w_isz, x_isz, o_isz):
    weights = (d * h0 + h0 * h1 + h1 * k) * w_isz            # single-buffered
    biases = (h0 + h1 + k) * 4
    io_tiles = 2 * bn * d * x_isz + 2 * bn * k * o_isz        # double-buffered
    interm = bn * (h0 + h1) * (4 + w_isz) + bn * k * 4        # f32 h + bf16 copy
    return weights + biases + io_tiles + interm


def _const_spec(shape):
    # Constant-index operand: single buffer (no pointless double-buffering).
    return pl.BlockSpec(shape, lambda i: (0, 0), pipeline_mode=pl.Buffered(1))


def f2_forward(x, w0, b0, w1, b1, w2, b2, *, block_n=512,
               compute_dtype=jnp.bfloat16, out_dtype=None):
    n, d = x.shape
    h0 = w0.shape[1]
    h1 = w1.shape[1]
    k = w2.shape[1]
    out_dtype = x.dtype if out_dtype is None else out_dtype

    # Weights cast to bf16 (tiny, one-time); biases kept f32 as (1, dim) rows.
    w0c = w0.astype(compute_dtype)
    w1c = w1.astype(compute_dtype)
    w2c = w2.astype(compute_dtype)
    b0r = b0.reshape(1, h0).astype(jnp.float32)
    b1r = b1.reshape(1, h1).astype(jnp.float32)
    b2r = b2.reshape(1, k).astype(jnp.float32)

    w_isz = jnp.dtype(compute_dtype).itemsize
    x_isz = jnp.dtype(x.dtype).itemsize
    o_isz = jnp.dtype(out_dtype).itemsize

    budget = _vmem_budget_bytes()

    # Batch tile: multiple of 128, capped by block_n and the batch itself.
    bn = max(LANE, min(_round_up(block_n, LANE), _round_up(n, LANE)))
    # v7x megacore: ensure >= 2 grid steps so both TensorCores get work
    # whenever the batch is large enough (harmless on v5e/v6e).
    if n > LANE and pl.cdiv(n, bn) < 2:
        bn = max(LANE, _round_up(pl.cdiv(n, 2), LANE))
    # Shrink the tile if the VMEM estimate exceeds the per-generation budget.
    while bn > LANE and _vmem_estimate(bn, d, h0, h1, k, w_isz, x_isz, o_isz) > budget:
        bn = max(LANE, _round_up(bn // 2, LANE))
    grid = (pl.cdiv(n, bn),)

    est = _vmem_estimate(bn, d, h0, h1, k, w_isz, x_isz, o_isz)
    vmem_limit = int(min(max(int(est * 1.5), 16 << 20), budget))

    # Advisory cost hint for XLA's scheduler.
    flops = 2 * n * (d * h0 + h0 * h1 + h1 * k)
    bytes_accessed = (n * d * x_isz
                      + (d * h0 + h0 * h1 + h1 * k) * w_isz
                      + (h0 + h1 + k) * 4
                      + n * k * o_isz)
    cost = pl.CostEstimate(flops=flops, transcendentals=0,
                           bytes_accessed=bytes_accessed)

    return pl.pallas_call(
        f2_kernel,
        out_shape=jax.ShapeDtypeStruct((n, k), out_dtype),
        grid=grid,
        in_specs=[
            pl.BlockSpec((bn, d), lambda i: (i, 0)),  # x (batch-tiled, ragged last block ok)
            _const_spec((d, h0)),                     # W0 (resident, single-buffered)
            _const_spec((1, h0)),                     # b0
            _const_spec((h0, h1)),                    # W1
            _const_spec((1, h1)),                     # b1
            _const_spec((h1, k)),                     # W2
            _const_spec((1, k)),                      # b2
        ],
        out_specs=pl.BlockSpec((bn, k), lambda i: (i, 0)),
        compiler_params=pltpu.CompilerParams(
            dimension_semantics=("parallel",),
            vmem_limit_bytes=vmem_limit,
        ),
        cost_estimate=cost,
    )(x, w0c, b0r, w1c, b1r, w2c, b2r)


def init_linear_params(key, dim_in, dim_out):
    """Mimics LinearLayer.__init__: Uniform(-alpha, alpha), alpha = 1/sqrt(dim_in)."""
    alpha = 1.0 / (dim_in ** 0.5)
    kw, kb = jax.random.split(key)
    w = jax.random.uniform(kw, (dim_in, dim_out), jnp.float32, -alpha, alpha)
    b = jax.random.uniform(kb, (dim_out,), jnp.float32, -alpha, alpha)
    return w, b


def _ref_forward(x, w0, b0, w1, b1, w2, b2, quantize=False):
    """Pure-JAX reference. quantize=True mimics the kernel's bf16 casts."""
    q = ((lambda a: a.astype(jnp.bfloat16).astype(jnp.float32))
         if quantize else (lambda a: a))
    mm = functools.partial(jnp.dot, precision=jax.lax.Precision.HIGHEST)
    h = jnp.maximum(mm(q(x), q(w0)) + b0, 0.0)
    h = jnp.maximum(mm(q(h), q(w1)) + b1, 0.0)
    return mm(q(h), q(w2)) + b2


def _run_case(n, d, h0, h1, k, seed):
    root = jax.random.PRNGKey(seed)
    kx, k0, k1, k2 = jax.random.split(root, 4)
    x = jax.random.normal(kx, (n, d), jnp.float32)
    w0, b0 = init_linear_params(k0, d, h0)
    w1, b1 = init_linear_params(k1, h0, h1)
    w2, b2 = init_linear_params(k2, h1, k)

    out = jax.block_until_ready(f2_forward(x, w0, b0, w1, b1, w2, b2))
    assert out.shape == (n, k)

    ref_q = _ref_forward(x, w0, b0, w1, b1, w2, b2, quantize=True)
    ref32 = _ref_forward(x, w0, b0, w1, b1, w2, b2, quantize=False)
    assert jnp.allclose(out, ref_q, atol=2e-3, rtol=2e-3), (
        f"max|diff| vs bf16 ref = {jnp.max(jnp.abs(out - ref_q))}")
    assert jnp.allclose(out, ref32, atol=5e-2, rtol=5e-2), (
        f"max|diff| vs f32 ref = {jnp.max(jnp.abs(out - ref32))}")


if __name__ == "__main__":
    # Case 1: small shapes consistent with F2(h0, h1, d, k); n deliberately NOT
    # a multiple of the tile and d/h/k all < 128 so the ragged last block and
    # the unpadded full-dim blocks are exercised.
    _run_case(n=37, d=32, h0=64, h1=32, k=10, seed=0)
    # Case 2: batch large enough for a 2-step parallel grid with a ragged tail.
    _run_case(n=300, d=64, h0=48, h1=32, k=10, seed=1)
    print("KERNEL_OK")
</pallas_src>

<mosaic_0001>
module attributes {stable_mosaic.version = 11 : i64} {
  func.func @f2_kernel(%arg0: i32, %arg1: memref<128x32xf32, #tpu.memory_space<vmem>>, %arg2: memref<32x64xbf16, #tpu.memory_space<vmem>>, %arg3: memref<1x64xf32, #tpu.memory_space<vmem>>, %arg4: memref<64x32xbf16, #tpu.memory_space<vmem>>, %arg5: memref<1x32xf32, #tpu.memory_space<vmem>>, %arg6: memref<32x10xbf16, #tpu.memory_space<vmem>>, %arg7: memref<1x10xf32, #tpu.memory_space<vmem>>, %arg8: memref<128x10xf32, #tpu.memory_space<vmem>>) attributes {dimension_semantics = [#tpu.dimension_semantics<parallel>], iteration_bounds = array<i64: 1>, scalar_prefetch = 0 : i64, scratch_operands = 0 : i64, tpu.core_type = #tpu.core_type<tc>, window_params = [{transform_indices = @transform_0, window_bounds = array<i64: 128, 32>}, {pipeline_mode = #tpu.pipeline_mode<synchronous>, transform_indices = @transform_1, window_bounds = array<i64: 32, 64>}, {pipeline_mode = #tpu.pipeline_mode<synchronous>, transform_indices = @transform_2, window_bounds = array<i64: 1, 64>}, {pipeline_mode = #tpu.pipeline_mode<synchronous>, transform_indices = @transform_3, window_bounds = array<i64: 64, 32>}, {pipeline_mode = #tpu.pipeline_mode<synchronous>, transform_indices = @transform_4, window_bounds = array<i64: 1, 32>}, {pipeline_mode = #tpu.pipeline_mode<synchronous>, transform_indices = @transform_5, window_bounds = array<i64: 32, 10>}, {pipeline_mode = #tpu.pipeline_mode<synchronous>, transform_indices = @transform_6, window_bounds = array<i64: 1, 10>}, {transform_indices = @transform_7, window_bounds = array<i64: 128, 10>}]} {
    %c0 = arith.constant 0 : index
    %c0_0 = arith.constant 0 : index
    %0 = vector.load %arg1[%c0, %c0_0] : memref<128x32xf32, #tpu.memory_space<vmem>>, vector<128x32xf32>
    %1 = arith.truncf %0 : vector<128x32xf32> to vector<128x32xbf16>
    %c0_1 = arith.constant 0 : index
    %c0_2 = arith.constant 0 : index
    %2 = vector.load %arg2[%c0_1, %c0_2] : memref<32x64xbf16, #tpu.memory_space<vmem>>, vector<32x64xbf16>
    %cst = arith.constant dense<0.000000e+00> : vector<128x64xf32>
    %3 = tpu.matmul %1, %2, %cst {dimension_numbers = #tpu.dot_dimension_numbers<[1], [0], [0], [1], [0, 0, 1, 1], [], []>} : vector<128x32xbf16>, vector<32x64xbf16>, vector<128x64xf32> -> vector<128x64xf32>
    %c0_3 = arith.constant 0 : index
    %c0_4 = arith.constant 0 : index
    %4 = vector.load %arg3[%c0_3, %c0_4] : memref<1x64xf32, #tpu.memory_space<vmem>>, vector<1x64xf32>
    %5 = vector.broadcast %4 : vector<1x64xf32> to vector<128x64xf32>
    %6 = arith.addf %3, %5 : vector<128x64xf32>
    %cst_5 = arith.constant 0.000000e+00 : f32
    %7 = vector.broadcast %cst_5 : f32 to vector<128x64xf32>
    %8 = arith.maximumf %6, %7 : vector<128x64xf32>
    %9 = arith.truncf %8 : vector<128x64xf32> to vector<128x64xbf16>
    %c0_6 = arith.constant 0 : index
    %c0_7 = arith.constant 0 : index
    %10 = vector.load %arg4[%c0_6, %c0_7] : memref<64x32xbf16, #tpu.memory_space<vmem>>, vector<64x32xbf16>
    %cst_8 = arith.constant dense<0.000000e+00> : vector<128x32xf32>
    %11 = tpu.matmul %9, %10, %cst_8 {dimension_numbers = #tpu.dot_dimension_numbers<[1], [0], [0], [1], [0, 0, 1, 1], [], []>} : vector<128x64xbf16>, vector<64x32xbf16>, vector<128x32xf32> -> vector<128x32xf32>
    %c0_9 = arith.constant 0 : index
    %c0_10 = arith.constant 0 : index
    %12 = vector.load %arg5[%c0_9, %c0_10] : memref<1x32xf32, #tpu.memory_space<vmem>>, vector<1x32xf32>
    %13 = vector.broadcast %12 : vector<1x32xf32> to vector<128x32xf32>
    %14 = arith.addf %11, %13 : vector<128x32xf32>
    %cst_11 = arith.constant 0.000000e+00 : f32
    %15 = vector.broadcast %cst_11 : f32 to vector<128x32xf32>
    %16 = arith.maximumf %14, %15 : vector<128x32xf32>
    %17 = arith.truncf %16 : vector<128x32xf32> to vector<128x32xbf16>
    %c0_12 = arith.constant 0 : index
    %c0_13 = arith.constant 0 : index
    %18 = vector.load %arg6[%c0_12, %c0_13] : memref<32x10xbf16, #tpu.memory_space<vmem>>, vector<32x10xbf16>
    %cst_14 = arith.constant dense<0.000000e+00> : vector<128x10xf32>
    %19 = tpu.matmul %17, %18, %cst_14 {dimension_numbers = #tpu.dot_dimension_numbers<[1], [0], [0], [1], [0, 0, 1, 1], [], []>} : vector<128x32xbf16>, vector<32x10xbf16>, vector<128x10xf32> -> vector<128x10xf32>
    %c0_15 = arith.constant 0 : index
    %c0_16 = arith.constant 0 : index
    %20 = vector.load %arg7[%c0_15, %c0_16] : memref<1x10xf32, #tpu.memory_space<vmem>>, vector<1x10xf32>
    %21 = vector.broadcast %20 : vector<1x10xf32> to vector<128x10xf32>
    %22 = arith.addf %19, %21 : vector<128x10xf32>
    %c0_17 = arith.constant 0 : index
    %c0_18 = arith.constant 0 : index
    %23 = vector.load %arg8[%c0_17, %c0_18] : memref<128x10xf32, #tpu.memory_space<vmem>>, vector<128x10xf32>
    tpu.vector_store %arg8[%c0_17, %c0_18], %22 {strides = array<i32>} : memref<128x10xf32, #tpu.memory_space<vmem>>, vector<128x10xf32>,
    return
  }
  func.func @transform_0(%arg0: i32) -> (i32, i32) {
    %c0_i32 = arith.constant 0 : i32
    %c0_i32_0 = arith.constant 0 : i32
    return %arg0, %c0_i32 : i32, i32
  }
  func.func @transform_1(%arg0: i32) -> (i32, i32) {
    %c0_i32 = arith.constant 0 : i32
    %c0_i32_0 = arith.constant 0 : i32
    %c0_i32_1 = arith.constant 0 : i32
    return %c0_i32, %c0_i32_0 : i32, i32
  }
  func.func @transform_2(%arg0: i32) -> (i32, i32) {
    %c0_i32 = arith.constant 0 : i32
    %c0_i32_0 = arith.constant 0 : i32
    %c0_i32_1 = arith.constant 0 : i32
    return %c0_i32, %c0_i32_0 : i32, i32
  }
  func.func @transform_3(%arg0: i32) -> (i32, i32) {
    %c0_i32 = arith.constant 0 : i32
    %c0_i32_0 = arith.constant 0 : i32
    %c0_i32_1 = arith.constant 0 : i32
    return %c0_i32, %c0_i32_0 : i32, i32
  }
  func.func @transform_4(%arg0: i32) -> (i32, i32) {
    %c0_i32 = arith.constant 0 : i32
    %c0_i32_0 = arith.constant 0 : i32
    %c0_i32_1 = arith.constant 0 : i32
    return %c0_i32, %c0_i32_0 : i32, i32
  }
  func.func @transform_5(%arg0: i32) -> (i32, i32) {
    %c0_i32 = arith.constant 0 : i32
    %c0_i32_0 = arith.constant 0 : i32
    %c0_i32_1 = arith.constant 0 : i32
    return %c0_i32, %c0_i32_0 : i32, i32
  }
  func.func @transform_6(%arg0: i32) -> (i32, i32) {
    %c0_i32 = arith.constant 0 : i32
    %c0_i32_0 = arith.constant 0 : i32
    %c0_i32_1 = arith.constant 0 : i32
    return %c0_i32, %c0_i32_0 : i32, i32
  }
  func.func @transform_7(%arg0: i32) -> (i32, i32) {
    %c0_i32 = arith.constant 0 : i32
    %c0_i32_0 = arith.constant 0 : i32
    return %arg0, %c0_i32 : i32, i32
  }
}

</mosaic_0001>

<bundles_post_ra>
// kernel: tpu_custom_call.1
= control target key start
LH: loop header
LB: loop body
LE: loop exit
PB: predicated region body
PF: predicated region fallthrough
CT: control target
= control target key end

     0   :  { %vm74_vm0 = vcmask 261120   ;;  %vm259_vm1 = vcmask 523264   ;;  %vm549_vm2 = vcmask 80896   ;;  %s930_s0 = inlined_call_operand.vmem [shape: f32[37,32], index: 0, kind: input, shape index: {}]   ;;  %s931_s1 = inlined_call_operand.vmem [shape: bf16[32,64], index: 1, kind: input, shape index: {}]   ;;  %s932_s2 = inlined_call_operand.vmem [shape: f32[1,64], index: 2, kind: input, shape index: {}]   ;;  %s933_s3 = inlined_call_operand.vmem [shape: bf16[64,32], index: 3, kind: input, shape index: {}]   ;;  %s934_s4 = inlined_call_operand.vmem [shape: f32[1,32], index: 4, kind: input, shape index: {}]   ;;  %s935_s5 = inlined_call_operand.vmem [shape: bf16[32,10], index: 5, kind: input, shape index: {}]   ;;  %s936_s6 = inlined_call_operand.vmem [shape: f32[1,10], index: 6, kind: input, shape index: {}]   ;;  %s937_s7 = inlined_call_operand.vmem [shape: f32[37,10], index: 7, kind: output, shape index: {}]  }
   0x1   :  { %v757_v0 = vld [vmem:[%s931_s1] sm:$0xff]   ;;  %v758_v1 = vld [vmem:[%s931_s1 + $0x8] sm:$0xff]   ;;  %v29_v5 = vld [vmem:[%s930_s0 + $0x10] sm:$0xff] }
   0x2   :  { %689 = vmatprep.subr.bf16.mxu0 %v757_v0  ;;  %v27_v2 = vld [vmem:[%s930_s0] sm:$0xff]  ;;  %v28_v3 = vld [vmem:[%s930_s0 + $0x8] sm:$0xff]  ;;  %753 = vmatprep.subr.bf16.mxu1 %v757_v0  ;;  %v30_v6 = vld [vmem:[%s930_s0 + $0x18] sm:$0xff] }
   0x3   :  { %690 = vmatpush3.bf16.msra.mxu0 %v757_v0  ;;  %v43_v4 = vpack.c.bf16 %v28_v3, %v27_v2  ;;  %755 = vmatpush3.bf16.msra.mxu1 %v757_v0  ;;  %v31_v7 = vld [vmem:[%s930_s0 + $0x20] sm:$0xff]  ;;  %v32_v8 = vld [vmem:[%s930_s0 + $0x28] sm:$0xff]  ;;  %v37_v11 = vld [vmem:[%s930_s0 + $0x50] sm:$0xff]  ;;  %v44_v13 = vpack.c.bf16 %v30_v6, %v29_v5 }
   0x4   :  { %691 = vmatprep.subr.bf16.mxu0 %v758_v1  ;;  %754 = vmatprep.subr.bf16.mxu1 %v758_v1  ;;  %v35_v9 = vld [vmem:[%s930_s0 + $0x40] sm:$0xff]  ;;  %v36_v10 = vld [vmem:[%s930_s0 + $0x48] sm:$0xff]  ;;  %v38_v12 = vld [vmem:[%s930_s0 + $0x58] sm:$0xff]  ;;  %v45_v18 = vpack.c.bf16 %v32_v8, %v31_v7 }
   0x5   :  { %693 = vmatprep.mubr.msk.bf16.mxu0 %vm74_vm0, %v43_v4  ;;  %v47_v14 = vpack.c.bf16 %v36_v10, %v35_v9  ;;  %v48_v15 = vpack.c.bf16 %v38_v12, %v37_v11  ;;  %v39_v16 = vld [vmem:[%s930_s0 + $0x60] sm:$0xff]  ;;  %v40_v17 = vld [vmem:[%s930_s0 + $0x68] sm:$0xff]  ;;  %v33_v21 = vld [vmem:[%s930_s0 + $0x30] sm:$0xff] }
   0x6   :  { %v49_v19 = vpack.c.bf16 %v40_v17, %v39_v16  ;;  %v759_v20 = vld [vmem:[%s933_s3] sm:$0xff]   ;;  %v34_v22 = vld [vmem:[%s930_s0 + $0x38] sm:$0xff]  ;;  %v41_v23 = vld [vmem:[%s930_s0 + $0x70] sm:$0xff] }
   0x7   :  { %692 = vmatpush3.bf16.msra.mxu0 %v758_v1  ;;  %756 = vmatpush3.bf16.msra.mxu1 %v758_v1  ;;  %v42_v24 = vld [vmem:[%s930_s0 + $0x78] sm:$0xff]  ;;  %v760_v25 = vld [vmem:[%s933_s3 + $0x8] sm:$0xff]   ;;  %v46_v26 = vpack.c.bf16 %v34_v22, %v33_v21  ;;  %v761_v28 = vld [vmem:[%s933_s3 + $0x10] sm:$0xff]  }
   0x8   :  { %701 = vmatprep.mubr.msk.bf16.mxu1 %vm74_vm0, %v47_v14  ;;  %709 = vmatprep.subr.bf16.mxu1 %v759_v20  ;;  %v50_v27 = vpack.c.bf16 %v42_v24, %v41_v23  ;;  %v762_v29 = vld [vmem:[%s933_s3 + $0x18] sm:$0xff]   ;;  %v763_v30 = vld [vmem:[%s935_s5] sm:$0xff]   ;;  %v764_v24 = vld [vmem:[%s935_s5 + $0x8] sm:$0xff]  }
   0x9   :  { %733 = vmatprep.subr.bf16.mxu0 %v763_v30  ;;  %v622_v31 = vld [vmem:[%s932_s2] ss:$0 sm:$0xff] }
   0xa   :  { %694 = vmatmul.mubr.msk.bf16.vlgmr.msra.gmra.mrb[0].mxu0 %vm74_vm0, %v44_v13  ;;  %702 = vmatmul.mubr.msk.bf16.vlgmr.msra.gmra.mrb[0].mxu1 %vm74_vm0, %v48_v15 }
   0xb   :  { %697 = vmatprep.mubr.msk.bf16.mxu0 %vm74_vm0, %v45_v18  ;;  %705 = vmatprep.mubr.msk.bf16.mxu1 %vm74_vm0, %v49_v19 }
   0xc   :  { %710 = vmatpush3.bf16.msra.mxu1 %v759_v20  ;;  %734 = vmatpush3.bf16.msra.mxu0 %v763_v30 }
   0xd   :  { %711 = vmatprep.subr.bf16.mxu1 %v760_v25  ;;  %735 = vmatprep.subr.bf16.mxu0 %v764_v24 }
  0x10   :  { %712 = vmatpush3.bf16.msra.mxu1 %v760_v25  ;;  %736 = vmatpush3.bf16.msra.mxu0 %v764_v24  ;;  %v633_v25 = vld [vmem:[%s934_s4] ss:$0 sm:$0xff] }
  0x11   :  { %713 = vmatprep.subr.bf16.mxu1 %v761_v28 }
  0x12   :  { %698 = vmatmul.mubr.msk.bf16.gmra.mrb[4].mxu0 %vm74_vm0, %v46_v26  ;;  %706 = vmatmul.mubr.msk.bf16.gmra.mrb[4].mxu1 %vm74_vm0, %v50_v27 }
  0x14   :  { %714 = vmatpush3.bf16.msra.mxu1 %v761_v28 }
  0x15   :  { %715 = vmatprep.subr.bf16.mxu1 %v762_v29 }
  0x18   :  { %716 = vmatpush3.bf16.msra.mxu1 %v762_v29 }
  0xdd   :  { %v695_v32 = vpop.f32.mrb[0].mxu0  ;;  %v703_v33 = vpop.f32.mrb[0].mxu1 }
  0xde   :  { %v142_v34 = vadd.f32 %v695_v32, %v622_v31  ;;  %v133_v35 = vpop.f32.mrb[1].mxu0  ;;  %v174_v36 = vadd.f32 %v703_v33, %v622_v31  ;;  %v165_v37 = vpop.f32.mrb[1].mxu1 }
  0xdf   :  { %v134_v38 = vadd.f32 %v622_v31, %v133_v35  ;;  %v696_v39 = vpop.f32.mrb[2].mxu0  ;;  %v166_v40 = vadd.f32 %v622_v31, %v165_v37  ;;  %v704_v41 = vpop.f32.mrb[2].mxu1 }
  0xe0   :  { %v145_v42 = vadd.f32 %v696_v39, %v622_v31  ;;  %v136_v43 = vpop.f32.mrb[3].mxu0  ;;  %v206_v44 = vmax.f32 %v174_v36, 0.0  ;;  %v177_v45 = vadd.f32 %v704_v41, %v622_v31  ;;  %v168_v46 = vpop.f32.mrb[3].mxu1  ;;  %v198_v50 = vmax.f32 %v142_v34, 0.0 }
  0xe1   :  { %v137_v47 = vadd.f32 %v622_v31, %v136_v43  ;;  %v204_v48 = vmax.f32 %v166_v40, 0.0  ;;  %v169_v49 = vadd.f32 %v622_v31, %v168_v46  ;;  %v196_v53 = vmax.f32 %v134_v38, 0.0 }
  0xe2   :  { %v199_v51 = vmax.f32 %v145_v42, 0.0  ;;  %v207_v52 = vmax.f32 %v177_v45, 0.0 }
  0xe3   :  { %v197_v54 = vmax.f32 %v137_v47, 0.0  ;;  %v205_v55 = vmax.f32 %v169_v49, 0.0 }
  0xe4   :  { %v213_v56 = vpack.c.bf16 %v199_v51, %v198_v50  ;;  %v217_v57 = vpack.c.bf16 %v207_v52, %v206_v44 }
  0xe5   :  { %v212_v58 = vpack.c.bf16 %v197_v54, %v196_v53  ;;  %v699_v59 = vpop.f32.mrb[4].mxu0  ;;  %v216_v60 = vpack.c.bf16 %v205_v55, %v204_v48  ;;  %v707_v61 = vpop.f32.mrb[4].mxu1 }
  0xe6   :  { %v158_v62 = vadd.f32 %v699_v59, %v622_v31  ;;  %v149_v63 = vpop.f32.mrb[5].mxu0  ;;  %v190_v0 = vadd.f32 %v707_v61, %v622_v31  ;;  %v181_v1 = vpop.f32.mrb[5].mxu1 }
  0xe7   :  { %v150_v2 = vadd.f32 %v622_v31, %v149_v63  ;;  %v700_v3 = vpop.f32.mrb[6].mxu0  ;;  %717 = vmatprep.mubr.msk.bf16.mxu1 %vm259_vm1, %v212_v58  ;;  %v182_v4 = vadd.f32 %v622_v31, %v181_v1  ;;  %v708_v5 = vpop.f32.mrb[6].mxu1 }
  0xe8   :  { %v161_v6 = vadd.f32 %v700_v3, %v622_v31  ;;  %v152_v7 = vpop.f32.mrb[7].mxu0  ;;  %718 = vmatmul.mubr.msk.bf16.vlgmr.msra.gmra.mrb[8].mxu1 %vm259_vm1, %v213_v56  ;;  %v210_v8 = vmax.f32 %v190_v0, 0.0  ;;  %v193_v9 = vadd.f32 %v708_v5, %v622_v31  ;;  %v184_v10 = vpop.f32.mrb[7].mxu1  ;;  %v202_v14 = vmax.f32 %v158_v62, 0.0 }
  0xe9   :  { %v153_v11 = vadd.f32 %v622_v31, %v152_v7  ;;  %v208_v12 = vmax.f32 %v182_v4, 0.0  ;;  %v185_v13 = vadd.f32 %v622_v31, %v184_v10  ;;  %v200_v17 = vmax.f32 %v150_v2, 0.0 }
  0xea   :  { %v203_v15 = vmax.f32 %v161_v6, 0.0  ;;  %v211_v16 = vmax.f32 %v193_v9, 0.0 }
  0xeb   :  { %v201_v18 = vmax.f32 %v153_v11, 0.0  ;;  %v209_v19 = vmax.f32 %v185_v13, 0.0 }
  0xec   :  { %v215_v20 = vpack.c.bf16 %v203_v15, %v202_v14  ;;  %v219_v21 = vpack.c.bf16 %v211_v16, %v210_v8 }
  0xed   :  { %v214_v22 = vpack.c.bf16 %v201_v18, %v200_v17  ;;  %v218_v23 = vpack.c.bf16 %v209_v19, %v208_v12  ;;  %v646_v18 = vld [vmem:[%s936_s6] ss:$0 sm:$0xff] }
  0xef   :  { %721 = vmatprep.mubr.msk.bf16.mxu1 %vm259_vm1, %v214_v22 }
  0xf0   :  { %722 = vmatmul.mubr.msk.bf16.gmra.mrb[12].mxu1 %vm259_vm1, %v215_v20 }
  0xf1   :  { %725 = vmatprep.mubr.msk.bf16.mxu1 %vm259_vm1, %v216_v60 }
  0xf8   :  { %726 = vmatmul.mubr.msk.bf16.gmra.mrb[16].mxu1 %vm259_vm1, %v217_v57 }
  0xf9   :  { %729 = vmatprep.mubr.msk.bf16.mxu1 %vm259_vm1, %v218_v23 }
 0x100   :  { %730 = vmatmul.mubr.msk.bf16.gmra.mrb[20].mxu1 %vm259_vm1, %v219_v21 }
 0x1bb   :  { %v719_v26 = vpop.f32.mrb[8].mxu1 }
 0x1bc   :  { %v327_v27 = vadd.f32 %v719_v26, %v633_v25  ;;  %v318_v28 = vpop.f32.mrb[9].mxu1 }
 0x1bd   :  { %v319_v29 = vadd.f32 %v633_v25, %v318_v28  ;;  %v720_v30 = vpop.f32.mrb[10].mxu1 }
 0x1be   :  { %v330_v31 = vadd.f32 %v720_v30, %v633_v25  ;;  %v321_v32 = vpop.f32.mrb[11].mxu1  ;;  %v383_v34 = vmax.f32 %v327_v27, 0.0 }
 0x1bf   :  { %v322_v33 = vadd.f32 %v633_v25, %v321_v32  ;;  %v381_v36 = vmax.f32 %v319_v29, 0.0 }
 0x1c0   :  { %v384_v35 = vmax.f32 %v330_v31, 0.0 }
 0x1c1   :  { %v382_v37 = vmax.f32 %v322_v33, 0.0 }
 0x1c2   :  { %v398_v38 = vpack.c.bf16 %v384_v35, %v383_v34 }
 0x1c3   :  { %v397_v39 = vpack.c.bf16 %v382_v37, %v381_v36  ;;  %v723_v40 = vpop.f32.mrb[12].mxu1 }
 0x1c4   :  { %v343_v41 = vadd.f32 %v723_v40, %v633_v25  ;;  %v334_v42 = vpop.f32.mrb[13].mxu1 }
 0x1c5   :  { %v335_v43 = vadd.f32 %v633_v25, %v334_v42  ;;  %v724_v44 = vpop.f32.mrb[14].mxu1  ;;  %737 = vmatprep.mubr.msk.bf16.mxu0 %vm74_vm0, %v397_v39 }
 0x1c6   :  { %v346_v45 = vadd.f32 %v724_v44, %v633_v25  ;;  %v337_v46 = vpop.f32.mrb[15].mxu1  ;;  %738 = vmatmul.mubr.msk.bf16.vlgmr.msra.gmra.mrb[8].mxu0 %vm74_vm0, %v398_v38  ;;  %v387_v48 = vmax.f32 %v343_v41, 0.0 }
 0x1c7   :  { %v338_v47 = vadd.f32 %v633_v25, %v337_v46  ;;  %v385_v50 = vmax.f32 %v335_v43, 0.0 }
 0x1c8   :  { %v388_v49 = vmax.f32 %v346_v45, 0.0 }
 0x1c9   :  { %v386_v51 = vmax.f32 %v338_v47, 0.0 }
 0x1ca   :  { %v400_v52 = vpack.c.bf16 %v388_v49, %v387_v48 }
 0x1cb   :  { %v399_v53 = vpack.c.bf16 %v386_v51, %v385_v50  ;;  %v727_v54 = vpop.f32.mrb[16].mxu1 }
 0x1cc   :  { %v359_v55 = vadd.f32 %v727_v54, %v633_v25  ;;  %v350_v56 = vpop.f32.mrb[17].mxu1 }
 0x1cd   :  { %v351_v57 = vadd.f32 %v633_v25, %v350_v56  ;;  %v728_v58 = vpop.f32.mrb[18].mxu1  ;;  %741 = vmatprep.mubr.msk.bf16.mxu0 %vm74_vm0, %v399_v53 }
 0x1ce   :  { %v362_v59 = vadd.f32 %v728_v58, %v633_v25  ;;  %v353_v60 = vpop.f32.mrb[19].mxu1  ;;  %742 = vmatmul.mubr.msk.bf16.gmra.mrb[12].mxu0 %vm74_vm0, %v400_v52  ;;  %v391_v62 = vmax.f32 %v359_v55, 0.0 }
 0x1cf   :  { %v354_v61 = vadd.f32 %v633_v25, %v353_v60  ;;  %v389_v0 = vmax.f32 %v351_v57, 0.0 }
 0x1d0   :  { %v392_v63 = vmax.f32 %v362_v59, 0.0 }
 0x1d1   :  { %v390_v1 = vmax.f32 %v354_v61, 0.0 }
 0x1d2   :  { %v402_v2 = vpack.c.bf16 %v392_v63, %v391_v62 }
 0x1d3   :  { %v401_v3 = vpack.c.bf16 %v390_v1, %v389_v0  ;;  %v731_v4 = vpop.f32.mrb[20].mxu1 }
 0x1d4   :  { %v375_v5 = vadd.f32 %v731_v4, %v633_v25  ;;  %v366_v6 = vpop.f32.mrb[21].mxu1 }
 0x1d5   :  { %v367_v7 = vadd.f32 %v633_v25, %v366_v6  ;;  %v732_v8 = vpop.f32.mrb[22].mxu1  ;;  %745 = vmatprep.mubr.msk.bf16.mxu0 %vm74_vm0, %v401_v3 }
 0x1d6   :  { %v378_v9 = vadd.f32 %v732_v8, %v633_v25  ;;  %v369_v10 = vpop.f32.mrb[23].mxu1  ;;  %746 = vmatmul.mubr.msk.bf16.gmra.mrb[16].mxu0 %vm74_vm0, %v402_v2  ;;  %v395_v12 = vmax.f32 %v375_v5, 0.0 }
 0x1d7   :  { %v370_v11 = vadd.f32 %v633_v25, %v369_v10  ;;  %v393_v14 = vmax.f32 %v367_v7, 0.0 }
 0x1d8   :  { %v396_v13 = vmax.f32 %v378_v9, 0.0 }
 0x1d9   :  { %v394_v15 = vmax.f32 %v370_v11, 0.0 }
 0x1da   :  { %v404_v16 = vpack.c.bf16 %v396_v13, %v395_v12 }
 0x1db   :  { %v403_v17 = vpack.c.bf16 %v394_v15, %v393_v14 }
 0x1dd   :  { %749 = vmatprep.mubr.msk.bf16.mxu0 %vm74_vm0, %v403_v17 }
 0x1de   :  { %750 = vmatmul.mubr.msk.bf16.gmra.mrb[20].mxu0 %vm74_vm0, %v404_v16 }
 0x299   :  { %v739_v19 = vpop.f32.mrb[8].mxu0 }
 0x29a   :  { %v495_v20 = vadd.f32 %v739_v19, %v646_v18  ;;  %v486_v21 = vpop.f32.mrb[9].mxu0 }
 0x29b   :  { %v487_v22 = vadd.f32 %v646_v18, %v486_v21  ;;  %v740_v23 = vpop.f32.mrb[10].mxu0 }
 0x29c   :  { %552 = vst.msk [vmem:[#allocation2 + $0x10] sm:$0xff] %vm549_vm2, %v495_v20  ;;  %v498_v24 = vadd.f32 %v740_v23, %v646_v18  ;;  %v489_v25 = vpop.f32.mrb[11].mxu0 }
 0x29d   :  { %550 = vst.msk [vmem:[#allocation2] sm:$0xff] %vm549_vm2, %v487_v22  ;;  %v490_v26 = vadd.f32 %v646_v18, %v489_v25 }
 0x29e   :  { %553 = vst.msk [vmem:[#allocation2 + $0x18] sm:$0xff] %vm549_vm2, %v498_v24 }
 0x29f   :  { %551 = vst.msk [vmem:[#allocation2 + $0x8] sm:$0xff] %vm549_vm2, %v490_v26 }
 0x2a1   :  { %v743_v27 = vpop.f32.mrb[12].mxu0 }
 0x2a2   :  { %v502_v28 = vpop.f32.mrb[13].mxu0 }
 0x2a3   :  { %v607_v29 = vld [vmem:[#allocation2 + $0x10] sm:$0xff]  ;;  %v503_v30 = vadd.f32 %v646_v18, %v502_v28  ;;  %v744_v31 = vpop.f32.mrb[14].mxu0 }
 0x2a4   :  { %608 = vst [vmem:[%s937_s7 + $0x10] sm:$0xff] %v607_v29  ;;  %v603_v32 = vld [vmem:[#allocation2] sm:$0xff]  ;;  %v505_v33 = vpop.f32.mrb[15].mxu0 }
 0x2a5   :  { %604 = vst [vmem:[%s937_s7] sm:$0xff] %v603_v32  ;;  %v609_v34 = vld [vmem:[#allocation2 + $0x18] sm:$0xff]  ;;  %554 = vst.msk [vmem:[#allocation2 + $0x20] sm:$0xff] %vm549_vm2, %v503_v30 }
 0x2a6   :  { %610 = vst [vmem:[%s937_s7 + $0x18] sm:$0xff] %v609_v34  ;;  %v605_v35 = vld [vmem:[#allocation2 + $0x8] sm:$0xff] }
 0x2a7   :  { %606 = vst [vmem:[%s937_s7 + $0x8] sm:$0xff] %v605_v35 }
 0x2a9   :  { %v747_v36 = vpop.f32.mrb[16].mxu0 }
 0x2aa   :  { %v518_v37 = vpop.f32.mrb[17].mxu0 }
 0x2ab   :  { %v748_v38 = vpop.f32.mrb[18].mxu0 }
 0x2ac   :  { %v611_v39 = vld [vmem:[#allocation2 + $0x20] sm:$0xff]  ;;  %v521_v40 = vpop.f32.mrb[19].mxu0 }
 0x2ad   :  { %612 = vst [vmem:[%s937_s7 + $0x20] sm:$0xff] %v611_v39 }
 0x2b1   :  { %v751_v41 = vpop.f32.mrb[20].mxu0 }
 0x2b2   :  { %v534_v42 = vpop.f32.mrb[21].mxu0 }
 0x2b3   :  { %v752_v43 = vpop.f32.mrb[22].mxu0 }
 0x2b4   :  { %v537_v44 = vpop.f32.mrb[23].mxu0 }

</bundles_post_ra>
